<compile_context>
chip_gen: v7x
topology: tpu7x:2x2x1
jax: 0.10.0
libtpu: 0.0.40
codegen_flags: <defaults>
</compile_context>

<pallas_src>
import jax
import jax.numpy as jnp
from jax.experimental import pallas as pl
from jax.experimental.pallas import tpu as pltpu

_LANE = 128
_SUBLANE = 8


def _round_up(n, m):
    return ((n + m - 1) // m) * m


def _mlp_kernel(x_ref, w1_ref, b1_ref, w2_ref, b2_ref, w3_ref, b3_ref, o_ref):
    # fc1 + ReLU   (dropout = identity at inference)
    x = x_ref[...].astype(jnp.bfloat16)
    h1 = jnp.dot(x, w1_ref[...], preferred_element_type=jnp.float32) + b1_ref[...]
    h1 = jnp.maximum(h1, 0.0)

    # fc2 + ReLU   (dropout = identity at inference)
    h2 = jnp.dot(h1.astype(jnp.bfloat16), w2_ref[...],
                 preferred_element_type=jnp.float32) + b2_ref[...]
    h2 = jnp.maximum(h2, 0.0)

    # fc3 + Sigmoid (exp -> EUP slot, approx reciprocal -> EUP slot)
    logits = jnp.dot(h2.astype(jnp.bfloat16), w3_ref[...],
                     preferred_element_type=jnp.float32) + b3_ref[...]
    o_ref[...] = pl.reciprocal(1.0 + jnp.exp(-logits), approx=True)


def single_layer_classifier(x, params, output_size):
    """x: (batch, input_size) f32. Returns sigmoid output with axis 1 squeezed
    (matching PyTorch x.squeeze(1) when output_size == 1)."""
    w1, b1, w2, b2, w3, b3 = params
    B, D = x.shape
    DP, H1P = w1.shape       # padded input / hidden1 (128)
    H2P = w2.shape[1]        # padded hidden2 (128)
    OP = w3.shape[1]         # padded output (128) -> lane-dense stores

    # Batch tile: largest that amortizes per-step overhead; splits big batches so
    # BlockSpec double-buffers the x/out tiles and v7x can shard tiles across TCs.
    # VMEM use is tiny (<2 MiB) vs. v7x's 64 MiB ceiling.
    TB = min(512, _round_up(B, _SUBLANE))
    B_pad = _round_up(B, TB)

    # Zero-pad batch rows and input lanes; padded x columns multiply zero-padded
    # rows of w1, so the padding is mathematically a no-op.
    x_pad = jnp.pad(x.astype(jnp.float32), ((0, B_pad - B), (0, DP - D)))

    const = lambda shape: pl.BlockSpec(shape, lambda i: (0, 0))  # VMEM-resident weights

    out = pl.pallas_call(
        _mlp_kernel,
        out_shape=jax.ShapeDtypeStruct((B_pad, OP), jnp.float32),
        grid=(B_pad // TB,),
        in_specs=[
            pl.BlockSpec((TB, DP), lambda i: (i, 0)),   # x, blocked over batch
            const((DP, H1P)), const((1, H1P)),
            const((H1P, H2P)), const((1, H2P)),
            const((H2P, OP)), const((1, OP)),
        ],
        out_specs=pl.BlockSpec((TB, OP), lambda i: (i, 0)),
        compiler_params=pltpu.CompilerParams(
            dimension_semantics=("parallel",)),
    )(x_pad, w1, b1, w2, b2, w3, b3)

    out = out[:B, :output_size]
    if output_size == 1:
        out = jnp.squeeze(out, axis=1)   # PyTorch: x.squeeze(1)
    return out


def init_params(key, input_size, output_size):
    """PyTorch nn.Linear default init (uniform +/- 1/sqrt(fan_in)), stored
    pre-transposed as (in, out), zero-padded to lane multiples of 128.
    Weights in bf16 (MXU-native), biases in f32. Padded rows/cols and padded
    biases are zero so padded channels stay exactly 0 through ReLU and never
    leak into the real outputs."""
    def linear(k, fan_in, fan_out, fan_in_pad, fan_out_pad):
        kw, kb = jax.random.split(k)
        bound = 1.0 / jnp.sqrt(fan_in)
        w = jax.random.uniform(kw, (fan_in, fan_out), jnp.float32, -bound, bound)
        b = jax.random.uniform(kb, (1, fan_out), jnp.float32, -bound, bound)
        w = jnp.pad(w, ((0, fan_in_pad - fan_in), (0, fan_out_pad - fan_out)))
        b = jnp.pad(b, ((0, 0), (0, fan_out_pad - fan_out)))
        return w.astype(jnp.bfloat16), b

    DP = _round_up(input_size, _LANE)
    H1P = _round_up(70, _LANE)
    H2P = _round_up(30, _LANE)
    OP = _round_up(output_size, _LANE)

    k1, k2, k3 = jax.random.split(key, 3)
    w1, b1 = linear(k1, input_size, 70, DP, H1P)
    w2, b2 = linear(k2, 70, 30, H1P, H2P)
    w3, b3 = linear(k3, 30, output_size, H2P, OP)
    return (w1, b1, w2, b2, w3, b3)


if __name__ == "__main__":
    key = jax.random.PRNGKey(0)
    k_x, k_p = jax.random.split(key)

    batch, input_size, output_size = 8, 32, 1
    x = jax.random.normal(k_x, (batch, input_size), jnp.float32)
    params = init_params(k_p, input_size, output_size)

    y = single_layer_classifier(x, params, output_size)
    jax.block_until_ready(y)

    # plain-JAX reference using the same (padded, bf16) parameters
    w1, b1, w2, b2, w3, b3 = [p.astype(jnp.float32) for p in params]
    xp = jnp.pad(x, ((0, 0), (0, w1.shape[0] - input_size)))
    h = jnp.maximum(xp @ w1 + b1, 0.0)
    h = jnp.maximum(h @ w2 + b2, 0.0)
    ref = jax.nn.sigmoid(h @ w3 + b3)[:, :output_size]
    ref = jnp.squeeze(ref, axis=1)

    assert y.shape == (batch,), y.shape
    assert jnp.allclose(y, ref, atol=2e-2), "mismatch vs reference"

    print("KERNEL_OK")
</pallas_src>

<mosaic_0001>
module attributes {stable_mosaic.version = 11 : i64} {
  func.func @_mlp_kernel(%arg0: i32, %arg1: memref<8x128xf32, #tpu.memory_space<vmem>>, %arg2: memref<128x128xbf16, #tpu.memory_space<vmem>>, %arg3: memref<1x128xf32, #tpu.memory_space<vmem>>, %arg4: memref<128x128xbf16, #tpu.memory_space<vmem>>, %arg5: memref<1x128xf32, #tpu.memory_space<vmem>>, %arg6: memref<128x128xbf16, #tpu.memory_space<vmem>>, %arg7: memref<1x128xf32, #tpu.memory_space<vmem>>, %arg8: memref<8x128xf32, #tpu.memory_space<vmem>>) attributes {dimension_semantics = [#tpu.dimension_semantics<parallel>], iteration_bounds = array<i64: 1>, scalar_prefetch = 0 : i64, scratch_operands = 0 : i64, tpu.core_type = #tpu.core_type<tc>, window_params = [{transform_indices = @transform_0, window_bounds = array<i64: 8, 128>}, {pipeline_mode = #tpu.pipeline_mode<synchronous>, transform_indices = @transform_1, window_bounds = array<i64: 128, 128>}, {pipeline_mode = #tpu.pipeline_mode<synchronous>, transform_indices = @transform_2, window_bounds = array<i64: 1, 128>}, {pipeline_mode = #tpu.pipeline_mode<synchronous>, transform_indices = @transform_3, window_bounds = array<i64: 128, 128>}, {pipeline_mode = #tpu.pipeline_mode<synchronous>, transform_indices = @transform_4, window_bounds = array<i64: 1, 128>}, {pipeline_mode = #tpu.pipeline_mode<synchronous>, transform_indices = @transform_5, window_bounds = array<i64: 128, 128>}, {pipeline_mode = #tpu.pipeline_mode<synchronous>, transform_indices = @transform_6, window_bounds = array<i64: 1, 128>}, {transform_indices = @transform_7, window_bounds = array<i64: 8, 128>}]} {
    %c0 = arith.constant 0 : index
    %c0_0 = arith.constant 0 : index
    %0 = vector.load %arg1[%c0, %c0_0] : memref<8x128xf32, #tpu.memory_space<vmem>>, vector<8x128xf32>
    %1 = arith.truncf %0 : vector<8x128xf32> to vector<8x128xbf16>
    %c0_1 = arith.constant 0 : index
    %c0_2 = arith.constant 0 : index
    %2 = vector.load %arg2[%c0_1, %c0_2] : memref<128x128xbf16, #tpu.memory_space<vmem>>, vector<128x128xbf16>
    %cst = arith.constant dense<0.000000e+00> : vector<8x128xf32>
    %3 = tpu.matmul %1, %2, %cst {dimension_numbers = #tpu.dot_dimension_numbers<[1], [0], [0], [1], [0, 0, 1, 1], [], []>} : vector<8x128xbf16>, vector<128x128xbf16>, vector<8x128xf32> -> vector<8x128xf32>
    %c0_3 = arith.constant 0 : index
    %c0_4 = arith.constant 0 : index
    %4 = vector.load %arg3[%c0_3, %c0_4] : memref<1x128xf32, #tpu.memory_space<vmem>>, vector<1x128xf32>
    %5 = vector.broadcast %4 : vector<1x128xf32> to vector<8x128xf32>
    %6 = arith.addf %3, %5 : vector<8x128xf32>
    %cst_5 = arith.constant 0.000000e+00 : f32
    %7 = vector.broadcast %cst_5 : f32 to vector<8x128xf32>
    %8 = arith.maximumf %6, %7 : vector<8x128xf32>
    %9 = arith.truncf %8 : vector<8x128xf32> to vector<8x128xbf16>
    %c0_6 = arith.constant 0 : index
    %c0_7 = arith.constant 0 : index
    %10 = vector.load %arg4[%c0_6, %c0_7] : memref<128x128xbf16, #tpu.memory_space<vmem>>, vector<128x128xbf16>
    %cst_8 = arith.constant dense<0.000000e+00> : vector<8x128xf32>
    %11 = tpu.matmul %9, %10, %cst_8 {dimension_numbers = #tpu.dot_dimension_numbers<[1], [0], [0], [1], [0, 0, 1, 1], [], []>} : vector<8x128xbf16>, vector<128x128xbf16>, vector<8x128xf32> -> vector<8x128xf32>
    %c0_9 = arith.constant 0 : index
    %c0_10 = arith.constant 0 : index
    %12 = vector.load %arg5[%c0_9, %c0_10] : memref<1x128xf32, #tpu.memory_space<vmem>>, vector<1x128xf32>
    %13 = vector.broadcast %12 : vector<1x128xf32> to vector<8x128xf32>
    %14 = arith.addf %11, %13 : vector<8x128xf32>
    %cst_11 = arith.constant 0.000000e+00 : f32
    %15 = vector.broadcast %cst_11 : f32 to vector<8x128xf32>
    %16 = arith.maximumf %14, %15 : vector<8x128xf32>
    %17 = arith.truncf %16 : vector<8x128xf32> to vector<8x128xbf16>
    %c0_12 = arith.constant 0 : index
    %c0_13 = arith.constant 0 : index
    %18 = vector.load %arg6[%c0_12, %c0_13] : memref<128x128xbf16, #tpu.memory_space<vmem>>, vector<128x128xbf16>
    %cst_14 = arith.constant dense<0.000000e+00> : vector<8x128xf32>
    %19 = tpu.matmul %17, %18, %cst_14 {dimension_numbers = #tpu.dot_dimension_numbers<[1], [0], [0], [1], [0, 0, 1, 1], [], []>} : vector<8x128xbf16>, vector<128x128xbf16>, vector<8x128xf32> -> vector<8x128xf32>
    %c0_15 = arith.constant 0 : index
    %c0_16 = arith.constant 0 : index
    %20 = vector.load %arg7[%c0_15, %c0_16] : memref<1x128xf32, #tpu.memory_space<vmem>>, vector<1x128xf32>
    %21 = vector.broadcast %20 : vector<1x128xf32> to vector<8x128xf32>
    %22 = arith.addf %19, %21 : vector<8x128xf32>
    %cst_17 = arith.constant 0.000000e+00 : f32
    %23 = vector.broadcast %cst_17 : f32 to vector<8x128xf32>
    %24 = arith.subf %23, %22 : vector<8x128xf32>
    %25 = math.exp %24 : vector<8x128xf32>
    %cst_18 = arith.constant 1.000000e+00 : f32
    %26 = vector.broadcast %cst_18 : f32 to vector<8x128xf32>
    %27 = arith.addf %26, %25 : vector<8x128xf32>
    %28 = tpu.reciprocal %27 {approx = true} : vector<8x128xf32> -> vector<8x128xf32>
    %c0_19 = arith.constant 0 : index
    %c0_20 = arith.constant 0 : index
    %29 = vector.load %arg8[%c0_19, %c0_20] : memref<8x128xf32, #tpu.memory_space<vmem>>, vector<8x128xf32>
    tpu.vector_store %arg8[%c0_19, %c0_20], %28 {strides = array<i32>} : memref<8x128xf32, #tpu.memory_space<vmem>>, vector<8x128xf32>,
    return
  }
  func.func @transform_0(%arg0: i32) -> (i32, i32) {
    %c0_i32 = arith.constant 0 : i32
    %c0_i32_0 = arith.constant 0 : i32
    return %arg0, %c0_i32 : i32, i32
  }
  func.func @transform_1(%arg0: i32) -> (i32, i32) {
    %c0_i32 = arith.constant 0 : i32
    %c0_i32_0 = arith.constant 0 : i32
    %c0_i32_1 = arith.constant 0 : i32
    return %c0_i32, %c0_i32_0 : i32, i32
  }
  func.func @transform_2(%arg0: i32) -> (i32, i32) {
    %c0_i32 = arith.constant 0 : i32
    %c0_i32_0 = arith.constant 0 : i32
    %c0_i32_1 = arith.constant 0 : i32
    return %c0_i32, %c0_i32_0 : i32, i32
  }
  func.func @transform_3(%arg0: i32) -> (i32, i32) {
    %c0_i32 = arith.constant 0 : i32
    %c0_i32_0 = arith.constant 0 : i32
    %c0_i32_1 = arith.constant 0 : i32
    return %c0_i32, %c0_i32_0 : i32, i32
  }
  func.func @transform_4(%arg0: i32) -> (i32, i32) {
    %c0_i32 = arith.constant 0 : i32
    %c0_i32_0 = arith.constant 0 : i32
    %c0_i32_1 = arith.constant 0 : i32
    return %c0_i32, %c0_i32_0 : i32, i32
  }
  func.func @transform_5(%arg0: i32) -> (i32, i32) {
    %c0_i32 = arith.constant 0 : i32
    %c0_i32_0 = arith.constant 0 : i32
    %c0_i32_1 = arith.constant 0 : i32
    return %c0_i32, %c0_i32_0 : i32, i32
  }
  func.func @transform_6(%arg0: i32) -> (i32, i32) {
    %c0_i32 = arith.constant 0 : i32
    %c0_i32_0 = arith.constant 0 : i32
    %c0_i32_1 = arith.constant 0 : i32
    return %c0_i32, %c0_i32_0 : i32, i32
  }
  func.func @transform_7(%arg0: i32) -> (i32, i32) {
    %c0_i32 = arith.constant 0 : i32
    %c0_i32_0 = arith.constant 0 : i32
    return %arg0, %c0_i32 : i32, i32
  }
}

</mosaic_0001>

<bundles_post_ra>
// kernel: tpu_custom_call.1
= control target key start
LH: loop header
LB: loop body
LE: loop exit
PB: predicated region body
PF: predicated region fallthrough
CT: control target
= control target key end

     0   :  { %12 = vsyncpa [#allocation3], 0  ;;  %s869_s0 = inlined_call_operand.hbm [shape: f32[8,128], index: 0, kind: input, shape index: {}]   ;;  %s870_s1 = inlined_call_operand.hbm [shape: bf16[128,128], index: 1, kind: input, shape index: {}]   ;;  %s871_s2 = inlined_call_operand.vmem [shape: f32[1,128], index: 2, kind: input, shape index: {}]   ;;  %s872_s3 = inlined_call_operand.hbm [shape: bf16[128,128], index: 3, kind: input, shape index: {}]   ;;  %s873_s4 = inlined_call_operand.vmem [shape: f32[1,128], index: 4, kind: input, shape index: {}]   ;;  %s874_s5 = inlined_call_operand.hbm [shape: bf16[128,128], index: 5, kind: input, shape index: {}]   ;;  %s875_s6 = inlined_call_operand.vmem [shape: f32[1,128], index: 6, kind: input, shape index: {}]   ;;  %s876_s7 = inlined_call_operand.hbm [shape: f32[8,128], index: 7, kind: output, shape index: {}]  }
   0x1   :  { %13 = vsyncpa [#allocation6], 0 }
   0x2   :  { %14 = vsyncpa [#allocation9], 0 }
   0x3   :  { %15 = vsyncpa [#allocation4], 0  ;;  %s712_s24 = smov [#allocation5]   ;;  %s594_s28 = scalar_lea.hbm %s870_s1, 1024 }
   0x4   :  { %s31_s25 = sshll.u32 %s712_s24, 4  ;;  %p595_p0 = scmp.ne.s32.totalorder %s870_s1, %s594_s28  ;;  %s32_s25 = int_to_ptr.vmem [resolvable:$true] %s31_s25 }
   0x5   :  { %p598_p1 = scmp.lt.u32.totalorder %s594_s28, %s870_s1 }
   0x7   :  { %p600_p2 = pnand %p598_p1, %p595_p0 }
   0x9   :  { %603 = shalt.err (!%p600_p2)
}
   0xa   :  { %s604_s10 = scalar_lea.vmem %s32_s25, 1024  ;;  %p609_p4 = scmp.lt.s32.totalorder %s32_s25, %s32_s25 }
   0xb   :  { %p605_p3 = scmp.ne.s32.totalorder %s32_s25, %s604_s10  ;;  %p610_p5 = scmp.lt.s32.totalorder %s604_s10, %s604_s10 }
   0xd   :  { %p611_p6 = por %p610_p5, %p609_p4 }
   0xf   :  { %p612_p7 = pnand %p611_p6, %p605_p3 }
  0x11   :  { %615 = shalt.err (!%p612_p7)
}
  0x12   :  { %s713_s11 = smov 64   ;;  %s714_s12 = smov 4  }
  0x13   :  { %37 = dma.hbm_to_vmem [thread:$0]  %s870_s1, 1024, %s32_s25, [#allocation6], %s713_s11, %s713_s11, %s714_s12  }
  0x14   :  { %s715_s15 = smov [#allocation2]   ;;  %s716_s17 = smov [#allocation7]  }
  0x15   :  { %s22_s16 = sshll.u32 %s715_s15, 4  ;;  %s45_s18 = sshll.u32 %s716_s17, 4  ;;  %s23_s16 = int_to_ptr.vmem [resolvable:$true] %s22_s16  ;;  %s46_s18 = int_to_ptr.vmem [resolvable:$true] %s45_s18 }
  0x16   :  { %s616_s21 = scalar_lea.hbm %s869_s0, 128 }
  0x17   :  { %p617_p8 = scmp.ne.s32.totalorder %s869_s0, %s616_s21  ;;  %p620_p9 = scmp.lt.u32.totalorder %s616_s21, %s869_s0 }
  0x19   :  { %p622_p10 = pnand %p620_p9, %p617_p8 }
  0x1b   :  { %625 = shalt.err (!%p622_p10)
}
  0x1c   :  { %s626_s1 = scalar_lea.vmem %s23_s16, 128  ;;  %p631_p12 = scmp.lt.s32.totalorder %s23_s16, %s23_s16 }
  0x1d   :  { %p627_p11 = scmp.ne.s32.totalorder %s23_s16, %s626_s1  ;;  %p632_p13 = scmp.lt.s32.totalorder %s626_s1, %s626_s1 }
  0x1f   :  { %p633_p0 = por %p632_p13, %p631_p12 }
  0x21   :  { %p634_p1 = pnand %p633_p0, %p627_p11 }
  0x23   :  { %637 = shalt.err (!%p634_p1)
}
  0x24   :  { %25 = dma.hbm_to_vmem [thread:$0]  %s869_s0, 128, %s23_s16, [#allocation3]  }
  0x25   :  { %s638_s30 = scalar_lea.hbm %s872_s3, 1024 }
  0x26   :  { %p639_p2 = scmp.ne.s32.totalorder %s872_s3, %s638_s30  ;;  %p642_p3 = scmp.lt.u32.totalorder %s638_s30, %s872_s3 }
  0x28   :  { %p644_p4 = pnand %p642_p3, %p639_p2 }
  0x2a   :  { %647 = shalt.err (!%p644_p4)
}
  0x2b   :  { %s648_s14 = scalar_lea.vmem %s46_s18, 1024  ;;  %p653_p6 = scmp.lt.s32.totalorder %s46_s18, %s46_s18 }
  0x2c   :  { %p649_p5 = scmp.ne.s32.totalorder %s46_s18, %s648_s14  ;;  %p654_p7 = scmp.lt.s32.totalorder %s648_s14, %s648_s14 }
  0x2e   :  { %p655_p8 = por %p654_p7, %p653_p6 }
  0x30   :  { %p656_p9 = pnand %p655_p8, %p649_p5 }
  0x32   :  { %659 = shalt.err (!%p656_p9)
}
  0x33   :  { %51 = dma.hbm_to_vmem [thread:$0]  %s872_s3, 1024, %s46_s18, [#allocation6], %s713_s11, %s713_s11, %s714_s12  }
  0x34   :  { %s717_s16 = smov [#allocation8]   ;;  %s660_s21 = scalar_lea.hbm %s874_s5, 1024 }
  0x35   :  { %s59_s17 = sshll.u32 %s717_s16, 4  ;;  %p661_p10 = scmp.ne.s32.totalorder %s874_s5, %s660_s21  ;;  %s60_s17 = int_to_ptr.vmem [resolvable:$true] %s59_s17 }
  0x36   :  { %p664_p11 = scmp.lt.u32.totalorder %s660_s21, %s874_s5 }
  0x38   :  { %p666_p12 = pnand %p664_p11, %p661_p10 }
  0x3a   :  { %669 = shalt.err (!%p666_p12)
}
  0x3b   :  { %s670_s1 = scalar_lea.vmem %s60_s17, 1024  ;;  %p675_p0 = scmp.lt.s32.totalorder %s60_s17, %s60_s17 }
  0x3c   :  { %p671_p13 = scmp.ne.s32.totalorder %s60_s17, %s670_s1  ;;  %p676_p1 = scmp.lt.s32.totalorder %s670_s1, %s670_s1 }
  0x3e   :  { %p677_p2 = por %p676_p1, %p675_p0 }
  0x40   :  { %p678_p3 = pnand %p677_p2, %p671_p13 }
  0x42   :  { %681 = shalt.err (!%p678_p3)
}
  0x43   :  { %65 = dma.hbm_to_vmem [thread:$0]  %s874_s5, 1024, %s60_s17, [#allocation9], %s713_s11, %s713_s11, %s714_s12  }
  0x44   :  { %704 = dma.done.wait [#allocation3], 128  }
  0x45   :  { %705 = vsyncadd [#allocation3], 4294967168 }
  0x46   :  { %706 = dma.done.wait [#allocation6], 2048  }
  0x47   :  { %707 = vsyncadd [#allocation6], 4294965248 }
  0x48   :  { %708 = dma.done.wait [#allocation9], 1024  }
  0x49   :  { %709 = vsyncadd [#allocation9], 4294966272  ;;  %v718_v0 = vmov 0.0   ;;  %vm719_vm0 = vmmov 0   ;;  %v566_v1 = vld [vmem:[#allocation5] sm:$0xff]   ;;  %v567_v2 = vld [vmem:[#allocation5 + $0x8] sm:$0xff]  }
  0x4a   :  { %497 = vmatprep.subr.bf16.mxu0 %v718_v0  ;;  %513 = vmatprep.mubr.msk.bf16.mxu0 %vm719_vm0, %v718_v0  ;;  %v568_v3 = vld [vmem:[#allocation5 + $0x10] sm:$0xff]   ;;  %v574_v4 = vld [vmem:[#allocation7] sm:$0xff]   ;;  %v569_v5 = vld [vmem:[#allocation5 + $0x18] sm:$0xff]  }
  0x4b   :  { %517 = vmatprep.subr.bf16.mxu1 %v718_v0  ;;  %533 = vmatprep.mubr.msk.bf16.mxu1 %vm719_vm0, %v718_v0  ;;  %v575_v6 = vld [vmem:[#allocation7 + $0x8] sm:$0xff]   ;;  %v570_v7 = vld [vmem:[#allocation5 + $0x20] sm:$0xff]   ;;  %v576_v8 = vld [vmem:[#allocation7 + $0x10] sm:$0xff]  }
  0x4c   :  { %498 = vmatpush3.bf16.msra.mxu0 %v566_v1  ;;  %518 = vmatpush3.bf16.msra.mxu1 %v574_v4  ;;  %v571_v9 = vld [vmem:[#allocation5 + $0x28] sm:$0xff]   ;;  %v577_v10 = vld [vmem:[#allocation7 + $0x18] sm:$0xff]   ;;  %v572_v11 = vld [vmem:[#allocation5 + $0x30] sm:$0xff]  }
  0x4d   :  { %499 = vmatprep.subr.bf16.mxu0 %v718_v0  ;;  %519 = vmatprep.subr.bf16.mxu1 %v718_v0  ;;  %v578_v12 = vld [vmem:[#allocation7 + $0x20] sm:$0xff]   ;;  %v573_v13 = vld [vmem:[#allocation5 + $0x38] sm:$0xff]   ;;  %v579_v15 = vld [vmem:[#allocation7 + $0x28] sm:$0xff]  }
  0x4e   :  { %v81_v14 = vld [vmem:[#allocation2] sm:$0xff]  ;;  %v580_v17 = vld [vmem:[#allocation7 + $0x30] sm:$0xff]   ;;  %v582_v19 = vld [vmem:[#allocation8] sm:$0xff]  }
  0x4f   :  { %v82_v16 = vpack.c.bf16 %v81_v14, %v81_v14  ;;  %v581_v18 = vld [vmem:[#allocation7 + $0x38] sm:$0xff]   ;;  %v583_v20 = vld [vmem:[#allocation8 + $0x8] sm:$0xff]   ;;  %v584_v21 = vld [vmem:[#allocation8 + $0x10] sm:$0xff]  }
  0x50   :  { %500 = vmatpush3.bf16.msra.mxu0 %v567_v2  ;;  %520 = vmatpush3.bf16.msra.mxu1 %v575_v6  ;;  %v585_v22 = vld [vmem:[#allocation8 + $0x18] sm:$0xff]   ;;  %v586_v23 = vld [vmem:[#allocation8 + $0x20] sm:$0xff]   ;;  %v587_v24 = vld [vmem:[#allocation8 + $0x28] sm:$0xff]  }
  0x51   :  { %501 = vmatprep.subr.bf16.mxu0 %v718_v0  ;;  %521 = vmatprep.subr.bf16.mxu1 %v718_v0  ;;  %v443_v25 = vld [vmem:[%s871_s2] ss:$0 sm:$0xff]  ;;  %v588_v33 = vld [vmem:[#allocation8 + $0x30] sm:$0xff]  }
  0x52   :  { %v589_v34 = vld [vmem:[#allocation8 + $0x38] sm:$0xff]  }
  0x53   :  { %v452_v35 = vld [vmem:[%s873_s4] ss:$0 sm:$0xff]  ;;  %s720_s4 = smov [#allocation10]  }
  0x54   :  { %502 = vmatpush3.bf16.msra.mxu0 %v568_v3  ;;  %522 = vmatpush3.bf16.msra.mxu1 %v576_v8  ;;  %v461_v43 = vld [vmem:[%s875_s6] ss:$0 sm:$0xff]  ;;  %s432_s28 = sshll.u32 %s720_s4, 4  ;;  %s433_s28 = int_to_ptr.vmem [resolvable:$true] %s432_s28 }
  0x55   :  { %503 = vmatprep.subr.bf16.mxu0 %v718_v0  ;;  %523 = vmatprep.subr.bf16.mxu1 %v718_v0  ;;  %s682_s29 = scalar_lea.vmem %s433_s28, 128  ;;  %p687_p5 = scmp.lt.s32.totalorder %s433_s28, %s433_s28 }
  0x56   :  { %p683_p4 = scmp.ne.s32.totalorder %s433_s28, %s682_s29  ;;  %p688_p6 = scmp.lt.s32.totalorder %s682_s29, %s682_s29 }
  0x58   :  { %504 = vmatpush3.bf16.msra.mxu0 %v569_v5  ;;  %524 = vmatpush3.bf16.msra.mxu1 %v577_v10  ;;  %p689_p7 = por %p688_p6, %p687_p5 }
  0x59   :  { %505 = vmatprep.subr.bf16.mxu0 %v718_v0  ;;  %525 = vmatprep.subr.bf16.mxu1 %v718_v0 }
  0x5a   :  { %p690_p8 = pnand %p689_p7, %p683_p4 }
  0x5c   :  { %506 = vmatpush3.bf16.msra.mxu0 %v570_v7  ;;  %526 = vmatpush3.bf16.msra.mxu1 %v578_v12 }
  0x5d   :  { %507 = vmatprep.subr.bf16.mxu0 %v718_v0  ;;  %527 = vmatprep.subr.bf16.mxu1 %v718_v0 }
  0x60   :  { %508 = vmatpush3.bf16.msra.mxu0 %v571_v9  ;;  %528 = vmatpush3.bf16.msra.mxu1 %v579_v15 }
  0x61   :  { %509 = vmatprep.subr.bf16.mxu0 %v718_v0  ;;  %529 = vmatprep.subr.bf16.mxu1 %v718_v0 }
  0x64   :  { %510 = vmatpush3.bf16.msra.mxu0 %v572_v11  ;;  %530 = vmatpush3.bf16.msra.mxu1 %v580_v17 }
  0x65   :  { %511 = vmatprep.subr.bf16.mxu0 %v718_v0  ;;  %531 = vmatprep.subr.bf16.mxu1 %v718_v0 }
  0x68   :  { %512 = vmatpush3.bf16.msra.mxu0 %v573_v13  ;;  %532 = vmatpush3.bf16.msra.mxu1 %v581_v18 }
  0x69   :  { %537 = vmatprep.subr.bf16.mxu0 %v718_v0 }
  0x6b   :  { %514 = vmatmul.mubr.bf16.vlgmr.msra.gmra.mrb[0].mxu0 %v82_v16 }
  0x6c   :  { %553 = vmatprep.mubr.msk.bf16.mxu0 %vm719_vm0, %v718_v0  ;;  %538 = vmatpush3.bf16.msra.mxu0 %v582_v19 }
  0x6d   :  { %539 = vmatprep.subr.bf16.mxu0 %v718_v0 }
  0x70   :  { %540 = vmatpush3.bf16.msra.mxu0 %v583_v20 }
  0x71   :  { %541 = vmatprep.subr.bf16.mxu0 %v718_v0 }
  0x74   :  { %542 = vmatpush3.bf16.msra.mxu0 %v584_v21 }
  0x75   :  { %543 = vmatprep.subr.bf16.mxu0 %v718_v0 }
  0x78   :  { %544 = vmatpush3.bf16.msra.mxu0 %v585_v22 }
  0x79   :  { %545 = vmatprep.subr.bf16.mxu0 %v718_v0 }
  0x7c   :  { %546 = vmatpush3.bf16.msra.mxu0 %v586_v23 }
  0x7d   :  { %547 = vmatprep.subr.bf16.mxu0 %v718_v0 }
  0x80   :  { %548 = vmatpush3.bf16.msra.mxu0 %v587_v24 }
  0x81   :  { %549 = vmatprep.subr.bf16.mxu0 %v718_v0 }
  0x84   :  { %550 = vmatpush3.bf16.msra.mxu0 %v588_v33 }
  0x85   :  { %551 = vmatprep.subr.bf16.mxu0 %v718_v0 }
  0x88   :  { %552 = vmatpush3.bf16.msra.mxu0 %v589_v34 }
 0x13e   :  { %v188_v26 = vpop.f32.mrb[0].mxu0 }
 0x13f   :  { %v189_v27 = vadd.f32 %v443_v25, %v188_v26  ;;  %v515_v28 = vpop.f32.mrb[1].mxu0 }
 0x140   :  { %v191_v29 = vpop.f32.mrb[2].mxu0 }
 0x141   :  { %v194_v30 = vmax.f32 %v189_v27, 0.0  ;;  %v516_v31 = vpop.f32.mrb[3].mxu0 }
 0x143   :  { %v195_v32 = vpack.c.bf16 %v194_v30, %v194_v30 }
 0x145   :  { %534 = vmatmul.mubr.bf16.vlgmr.msra.gmra.mrb[0].mxu1 %v195_v32 }
 0x218   :  { %v301_v36 = vpop.f32.mrb[0].mxu1 }
 0x219   :  { %v302_v37 = vadd.f32 %v452_v35, %v301_v36  ;;  %v535_v38 = vpop.f32.mrb[1].mxu1 }
 0x21a   :  { %v304_v39 = vpop.f32.mrb[2].mxu1 }
 0x21b   :  { %v307_v40 = vmax.f32 %v302_v37, 0.0  ;;  %v536_v41 = vpop.f32.mrb[3].mxu1 }
 0x21d   :  { %v308_v42 = vpack.c.bf16 %v307_v40, %v307_v40 }
 0x21f   :  { %554 = vmatmul.mubr.bf16.vlgmr.msra.gmra.mrb[4].mxu0 %v308_v42 }
 0x2f2   :  { %v414_v44 = vpop.f32.mrb[4].mxu0 }
 0x2f3   :  { %v415_v45 = vadd.f32 %v461_v43, %v414_v44  ;;  %v555_v46 = vpop.f32.mrb[5].mxu0 }
 0x2f4   :  { %v417_v47 = vpop.f32.mrb[6].mxu0 }
 0x2f5   :  { %v420_v48 = vsub.f32 0.0, %v415_v45  ;;  %v556_v49 = vpop.f32.mrb[7].mxu0 }
 0x2f7   :  { %v421_v50 = vmul.f32 1.442695, %v420_v48 }
 0x2f9   :  { %590 = vpow2.f32 %v421_v50 }
 0x303   :  { %v591_v51 = vpop.eup %590 }
 0x304   :  { %v423_v52 = vadd.f32 1.0, %v591_v51 }
 0x306   :  { %592 = vrcp.f32 %v423_v52 }
 0x310   :  { %v593_v53 = vpop.eup %592 }
 0x311   :  { %425 = vst [vmem:[#allocation10] sm:$0xff] %v593_v53 }
 0x312   :  { %693 = shalt.err (!%p690_p8)
}
 0x313   :  { %s694_s8 = scalar_lea.hbm %s876_s7, 128 }
 0x314   :  { %p695_p9 = scmp.ne.s32.totalorder %s876_s7, %s694_s8  ;;  %p698_p10 = scmp.lt.u32.totalorder %s694_s8, %s876_s7 }
 0x316   :  { %p700_p11 = pnand %p698_p10, %p695_p9 }
 0x318   :  { %703 = shalt.err (!%p700_p11)
}
 0x319   :  { %435 = dma.vmem_to_hbm [thread:$0]  %s433_s28, 128, %s876_s7, [#allocation4]  }
 0x31a   :  { %710 = dma.done.wait [#allocation4], 128  }
 0x31b   :  { %711 = vsyncadd [#allocation4], 4294967168 }
 0x31c   :  { %439 = vsyncpa [#allocation3], 1 }
 0x31d   :  { %440 = vsyncpa [#allocation6], 1 }
 0x31e   :  { %441 = vsyncpa [#allocation9], 1 }
 0x31f   :  { %442 = vsyncpa [#allocation4], 1 }

</bundles_post_ra>
